<compile_context>
chip_gen: v7x
topology: tpu7x:2x2x1
jax: 0.10.0
libtpu: 0.0.40
codegen_flags: <defaults>
</compile_context>

<pallas_src>
import functools

import jax
import jax.numpy as jnp
from jax import lax
from jax.experimental import pallas as pl
from jax.experimental.pallas import tpu as pltpu


# --------------------------------------------------------------------------
# Kernels
# --------------------------------------------------------------------------
def _bn_fused_kernel(x_ref, w_ref, b_ref, o_ref, *, inv_n, eps):
    """Single-pass, VMEM-resident batch norm: stats + normalize in one sweep."""
    x = x_ref[...].astype(jnp.float32)                       # (B, C, S)
    s1 = jnp.sum(jnp.sum(x, axis=2, keepdims=True), axis=0, keepdims=True)
    s2 = jnp.sum(jnp.sum(x * x, axis=2, keepdims=True), axis=0, keepdims=True)
    mean = s1 * inv_n
    # Clamp: E[x^2] - mean^2 can go slightly negative in f32 (cancellation).
    var = jnp.maximum(s2 * inv_n - mean * mean, 0.0)
    scale = w_ref[...] * lax.rsqrt(var + eps)                # (1, C, 1)
    shift = b_ref[...] - mean * scale
    o_ref[...] = (x * scale + shift).astype(o_ref.dtype)


def _bn_stats_kernel(x_ref, psum_ref, psq_ref, *, s_size, ts):
    """Per-row (row = (batch, channel)) sum / sum-of-squares partials.

    grid = (row_blocks [parallel], spatial_blocks [arbitrary]); the output
    block (indexed only by the row axis) stays resident across the spatial
    reduction axis and acts as the accumulator.
    """
    si = pl.program_id(1)

    @pl.when(si == 0)
    def _init():
        psum_ref[...] = jnp.zeros_like(psum_ref)
        psq_ref[...] = jnp.zeros_like(psq_ref)

    x = x_ref[...].astype(jnp.float32)                        # (TR, TS)

    def _accum(xv):
        psum_ref[...] += jnp.sum(xv, axis=1, keepdims=True)
        psq_ref[...] += jnp.sum(xv * xv, axis=1, keepdims=True)

    if s_size % ts == 0:
        _accum(x)                                             # never ragged
    else:
        last = pl.num_programs(1) - 1

        @pl.when(si != last)                                  # unmasked fast path
        def _full():
            _accum(x)

        @pl.when(si == last)                                  # mask only the tail
        def _tail():
            lane_idx = lax.broadcasted_iota(jnp.int32, x.shape, 1)
            _accum(jnp.where(si * ts + lane_idx < s_size, x, 0.0))


def _bn_norm_kernel(x_ref, scale_ref, shift_ref, o_ref):
    """Streaming FMA: y = x * scale[lane] + shift[lane] (per-element vectors)."""
    x = x_ref[...].astype(jnp.float32)                        # (TB, TL)
    o_ref[...] = (x * scale_ref[...] + shift_ref[...]).astype(o_ref.dtype)


# --------------------------------------------------------------------------
# Tiling helpers
# --------------------------------------------------------------------------
def _round_up(v, a):
    return -(-v // a) * a


def _pick_tiles_2d(rows, cols, itemsize, target_bytes):
    """Pick a (TR, TC) block for a row-major (rows, cols) array.

    TC is the full column extent or a multiple of 128 (lane-dense); TR is the
    full row extent or a multiple of the dtype's sublane packing.  Block sizes
    are balanced so ragged boundary blocks stay small.
    """
    row_align = max(8, 32 // itemsize)                        # 8 f32 / 16 bf16 / 32 int8
    lane = 128
    if cols <= lane or cols * row_align * itemsize <= target_bytes:
        tc = cols                                             # full lane extent
    else:
        tc = max(lane, (target_bytes // (row_align * itemsize)) // lane * lane)
        tc = min(tc, (cols // lane) * lane)
        nb = -(-cols // tc)                                   # balance the split
        tc = max(lane, min(tc, _round_up(-(-cols // nb), lane)))
    tr = max(1, target_bytes // (tc * itemsize))
    if tr >= rows:
        tr = rows
    else:
        tr = max(row_align, (tr // row_align) * row_align)
        nb = -(-rows // tr)
        tr = max(row_align, min(tr, _round_up(-(-rows // nb), row_align)))
        tr = min(tr, rows)
    return tr, tc


def _vmem_capacity_bytes():
    try:
        return int(pltpu.get_tpu_info().vmem_capacity_bytes)
    except Exception:
        return 64 << 20                                       # conservative (v7x)


# --------------------------------------------------------------------------
# Wrapper
# --------------------------------------------------------------------------
def complex_batch_norm_2d(m, phi, weight, bias, *, eps=1e-5,
                          force_two_pass=False,
                          stats_block_bytes=4 << 20,
                          norm_block_bytes=2 << 20):
    """Pallas implementation of ComplexBatchNorm2d.forward(m, phi)
    (training-mode batch statistics, affine=True)."""
    # TODO(synk): running_mean/running_var buffer updates (and eval-mode
    # normalization) are module-state side effects, not part of the returned
    # forward value; the batch statistics are available in the wrapper if a
    # caller needs to maintain those buffers.
    B, C, H, W = m.shape
    S = H * W
    itemsize = jnp.dtype(m.dtype).itemsize
    n_elem = B * C * S
    inv_n = 1.0 / (B * S)

    vmem_cap = _vmem_capacity_bytes()

    # ---------------- fast path: whole tensor resident in VMEM ----------------
    # Budget ~8 f32-sized copies of the tensor (in/out buffers + elementwise
    # temporaries) against half of physical VMEM -> threshold auto-halves on v7x.
    fast_vmem_limit = vmem_cap // 2
    if (not force_two_pass) and (8 * 4 * n_elem <= fast_vmem_limit):
        x = m.reshape(B, C, S)                                # metadata-only
        w3 = weight.reshape(1, C, 1).astype(jnp.float32)
        b3 = bias.reshape(1, C, 1).astype(jnp.float32)
        out = pl.pallas_call(
            functools.partial(_bn_fused_kernel, inv_n=inv_n, eps=eps),
            out_shape=jax.ShapeDtypeStruct((B, C, S), m.dtype),
            grid=(1,),
            in_specs=[pl.BlockSpec((B, C, S), lambda i: (0, 0, 0)),
                      pl.BlockSpec((1, C, 1), lambda i: (0, 0, 0)),
                      pl.BlockSpec((1, C, 1), lambda i: (0, 0, 0))],
            out_specs=pl.BlockSpec((B, C, S), lambda i: (0, 0, 0)),
            compiler_params=pltpu.CompilerParams(
                dimension_semantics=("arbitrary",),
                vmem_limit_bytes=fast_vmem_limit),
        )(x, w3, b3)
        return out.reshape(B, C, H, W), phi

    # ---------------- general path: two streaming passes ----------------
    vmem_limit = min(vmem_cap // 2, 32 << 20)                 # safe on every gen

    # Pass 1: per-row partial sums on the (B*C, S) view (full sublane occupancy
    # even when C < 8), row axis parallel for megacore.
    R = B * C
    x2 = m.reshape(R, S)                                      # metadata-only
    TRs, TSs = _pick_tiles_2d(R, S, itemsize, stats_block_bytes)
    grid_s = (pl.cdiv(R, TRs), pl.cdiv(S, TSs))
    psum, psq = pl.pallas_call(
        functools.partial(_bn_stats_kernel, s_size=S, ts=TSs),
        out_shape=(jax.ShapeDtypeStruct((R, 1), jnp.float32),
                   jax.ShapeDtypeStruct((R, 1), jnp.float32)),
        grid=grid_s,
        in_specs=[pl.BlockSpec((TRs, TSs), lambda r, s: (r, s))],
        out_specs=(pl.BlockSpec((TRs, 1), lambda r, s: (r, 0)),
                   pl.BlockSpec((TRs, 1), lambda r, s: (r, 0))),
        compiler_params=pltpu.CompilerParams(
            dimension_semantics=("parallel", "arbitrary"),
            vmem_limit_bytes=vmem_limit),
    )(x2)

    # Tiny wrapper-side reduction over batch + scale/shift (computed once, not
    # per grid step; variance clamped before rsqrt).
    ch_sum = jnp.sum(psum.reshape(B, C), axis=0)              # (C,)
    ch_sq = jnp.sum(psq.reshape(B, C), axis=0)
    mean = ch_sum * inv_n
    var = jnp.maximum(ch_sq * inv_n - mean * mean, 0.0)
    scale_c = weight.astype(jnp.float32) * lax.rsqrt(var + eps)
    shift_c = bias.astype(jnp.float32) - mean * scale_c
    scale_e = jnp.broadcast_to(scale_c[:, None], (C, S)).reshape(1, C * S)
    shift_e = jnp.broadcast_to(shift_c[:, None], (C, S)).reshape(1, C * S)

    # Pass 2: lane-dense streaming FMA on the (B, C*S) view.  Grid ordered
    # (lane-block, batch-block) so scale/shift blocks are fetched once per
    # lane-block, not once per grid step.
    L = C * S
    x3 = m.reshape(B, L)                                      # metadata-only
    TBn, TLn = _pick_tiles_2d(B, L, itemsize, norm_block_bytes)
    grid_n = (pl.cdiv(L, TLn), pl.cdiv(B, TBn))
    out = pl.pallas_call(
        _bn_norm_kernel,
        out_shape=jax.ShapeDtypeStruct((B, L), m.dtype),
        grid=grid_n,
        in_specs=[pl.BlockSpec((TBn, TLn), lambda l, b: (b, l)),
                  pl.BlockSpec((1, TLn), lambda l, b: (0, l)),
                  pl.BlockSpec((1, TLn), lambda l, b: (0, l))],
        out_specs=pl.BlockSpec((TBn, TLn), lambda l, b: (b, l)),
        compiler_params=pltpu.CompilerParams(
            dimension_semantics=("parallel", "parallel"),
            vmem_limit_bytes=vmem_limit),
    )(x3, scale_e, shift_e)

    return out.reshape(B, C, H, W), phi                       # phi pass-through


# --------------------------------------------------------------------------
# Demo / self-test
# --------------------------------------------------------------------------
if __name__ == "__main__":
    key = jax.random.PRNGKey(0)
    k_m, k_phi, k_w, k_b, k_m2 = jax.random.split(key, 5)

    def reference(m, weight, bias, eps=1e-5):
        C = m.shape[1]
        mean = jnp.mean(m, axis=(0, 2, 3), keepdims=True)
        var = jnp.mean((m - mean) ** 2, axis=(0, 2, 3), keepdims=True)
        return ((m - mean) / jnp.sqrt(var + eps) * weight.reshape(1, C, 1, 1)
                + bias.reshape(1, C, 1, 1))

    # Case 1: module-sized input -> exercises the fused single-pass path.
    B, C, H, W = 2, 4, 16, 16                                 # in_channels = 4
    m = jax.random.normal(k_m, (B, C, H, W), dtype=jnp.float32)
    phi = jax.random.normal(k_phi, (B, C, H, W), dtype=jnp.float32)
    weight = jnp.ones((C,), jnp.float32) + 0.1 * jax.random.normal(k_w, (C,), jnp.float32)
    bias = 0.1 * jax.random.normal(k_b, (C,), jnp.float32)

    out_m, out_phi = complex_batch_norm_2d(m, phi, weight, bias)
    jax.block_until_ready((out_m, out_phi))
    assert jnp.allclose(out_m, reference(m, weight, bias), atol=1e-4, rtol=1e-4)
    assert jnp.array_equal(out_phi, phi)

    # Case 2: force the streaming two-pass path with tiny blocks so both
    # kernels, ragged row blocks and ragged spatial/lane tails all run.
    B2, C2, H2, W2 = 3, 5, 9, 21
    m2 = jax.random.normal(k_m2, (B2, C2, H2, W2), dtype=jnp.float32)
    phi2 = jnp.zeros_like(m2)
    w2 = jnp.linspace(0.5, 1.5, C2, dtype=jnp.float32)
    b2 = jnp.linspace(-0.2, 0.2, C2, dtype=jnp.float32)
    out2, out_phi2 = complex_batch_norm_2d(m2, phi2, w2, b2, force_two_pass=True,
                                           stats_block_bytes=4096,
                                           norm_block_bytes=4096)
    jax.block_until_ready((out2, out_phi2))
    assert jnp.allclose(out2, reference(m2, w2, b2), atol=1e-4, rtol=1e-4)
    assert jnp.array_equal(out_phi2, phi2)

    print("KERNEL_OK")
</pallas_src>

<mosaic_0001>
module attributes {stable_mosaic.version = 11 : i64} {
  func.func @_bn_fused_kernel(%arg0: i32, %arg1: memref<2x4x256xf32, #tpu.memory_space<vmem>>, %arg2: memref<1x4x1xf32, #tpu.memory_space<vmem>>, %arg3: memref<1x4x1xf32, #tpu.memory_space<vmem>>, %arg4: memref<2x4x256xf32, #tpu.memory_space<vmem>>) attributes {dimension_semantics = [#tpu.dimension_semantics<arbitrary>], iteration_bounds = array<i64: 1>, scalar_prefetch = 0 : i64, scratch_operands = 0 : i64, tpu.core_type = #tpu.core_type<tc>, window_params = [{pipeline_mode = #tpu.pipeline_mode<synchronous>, transform_indices = @transform_0, window_bounds = array<i64: 2, 4, 256>}, {pipeline_mode = #tpu.pipeline_mode<synchronous>, transform_indices = @transform_1, window_bounds = array<i64: 1, 4, 1>}, {pipeline_mode = #tpu.pipeline_mode<synchronous>, transform_indices = @transform_2, window_bounds = array<i64: 1, 4, 1>}, {pipeline_mode = #tpu.pipeline_mode<synchronous>, transform_indices = @transform_3, window_bounds = array<i64: 2, 4, 256>}]} {
    %c0 = arith.constant 0 : index
    %c0_0 = arith.constant 0 : index
    %c0_1 = arith.constant 0 : index
    %0 = vector.load %arg1[%c0, %c0_0, %c0_1] : memref<2x4x256xf32, #tpu.memory_space<vmem>>, vector<2x4x256xf32>
    %cst = arith.constant dense<0.000000e+00> : vector<2x4xf32>
    %1 = vector.multi_reduction <add>, %0, %cst [2] : vector<2x4x256xf32> to vector<2x4xf32>
    %2 = vector.shape_cast %1 : vector<2x4xf32> to vector<2x4x1xf32>
    %cst_2 = arith.constant dense<0.000000e+00> : vector<4x1xf32>
    %3 = vector.multi_reduction <add>, %2, %cst_2 [0] : vector<2x4x1xf32> to vector<4x1xf32>
    %4 = vector.shape_cast %3 : vector<4x1xf32> to vector<1x4x1xf32>
    %5 = arith.mulf %0, %0 : vector<2x4x256xf32>
    %cst_3 = arith.constant dense<0.000000e+00> : vector<2x4xf32>
    %6 = vector.multi_reduction <add>, %5, %cst_3 [2] : vector<2x4x256xf32> to vector<2x4xf32>
    %7 = vector.shape_cast %6 : vector<2x4xf32> to vector<2x4x1xf32>
    %cst_4 = arith.constant dense<0.000000e+00> : vector<4x1xf32>
    %8 = vector.multi_reduction <add>, %7, %cst_4 [0] : vector<2x4x1xf32> to vector<4x1xf32>
    %9 = vector.shape_cast %8 : vector<4x1xf32> to vector<1x4x1xf32>
    %cst_5 = arith.constant 0.001953125 : f32
    %10 = vector.broadcast %cst_5 : f32 to vector<1x4x1xf32>
    %11 = arith.mulf %4, %10 : vector<1x4x1xf32>
    %cst_6 = arith.constant 0.001953125 : f32
    %12 = vector.broadcast %cst_6 : f32 to vector<1x4x1xf32>
    %13 = arith.mulf %9, %12 : vector<1x4x1xf32>
    %14 = arith.mulf %11, %11 : vector<1x4x1xf32>
    %15 = arith.subf %13, %14 : vector<1x4x1xf32>
    %cst_7 = arith.constant 0.000000e+00 : f32
    %16 = vector.broadcast %cst_7 : f32 to vector<1x4x1xf32>
    %17 = arith.maximumf %15, %16 : vector<1x4x1xf32>
    %c0_8 = arith.constant 0 : index
    %c0_9 = arith.constant 0 : index
    %c0_10 = arith.constant 0 : index
    %18 = vector.load %arg2[%c0_8, %c0_9, %c0_10] : memref<1x4x1xf32, #tpu.memory_space<vmem>>, vector<1x4x1xf32>
    %cst_11 = arith.constant 9.99999974E-6 : f32
    %19 = vector.broadcast %cst_11 : f32 to vector<1x4x1xf32>
    %20 = arith.addf %17, %19 : vector<1x4x1xf32>
    %21 = math.rsqrt %20 : vector<1x4x1xf32>
    %22 = arith.mulf %18, %21 : vector<1x4x1xf32>
    %c0_12 = arith.constant 0 : index
    %c0_13 = arith.constant 0 : index
    %c0_14 = arith.constant 0 : index
    %23 = vector.load %arg3[%c0_12, %c0_13, %c0_14] : memref<1x4x1xf32, #tpu.memory_space<vmem>>, vector<1x4x1xf32>
    %24 = arith.mulf %11, %22 : vector<1x4x1xf32>
    %25 = arith.subf %23, %24 : vector<1x4x1xf32>
    %26 = vector.broadcast %22 : vector<1x4x1xf32> to vector<2x4x256xf32>
    %27 = arith.mulf %0, %26 : vector<2x4x256xf32>
    %28 = vector.broadcast %25 : vector<1x4x1xf32> to vector<2x4x256xf32>
    %29 = arith.addf %27, %28 : vector<2x4x256xf32>
    %c0_15 = arith.constant 0 : index
    %c0_16 = arith.constant 0 : index
    %c0_17 = arith.constant 0 : index
    %30 = vector.load %arg4[%c0_15, %c0_16, %c0_17] : memref<2x4x256xf32, #tpu.memory_space<vmem>>, vector<2x4x256xf32>
    tpu.vector_store %arg4[%c0_15, %c0_16, %c0_17], %29 {strides = array<i32>} : memref<2x4x256xf32, #tpu.memory_space<vmem>>, vector<2x4x256xf32>,
    return
  }
  func.func @transform_0(%arg0: i32) -> (i32, i32, i32) {
    %c0_i32 = arith.constant 0 : i32
    %c0_i32_0 = arith.constant 0 : i32
    %c0_i32_1 = arith.constant 0 : i32
    %c0_i32_2 = arith.constant 0 : i32
    return %c0_i32, %c0_i32_0, %c0_i32_1 : i32, i32, i32
  }
  func.func @transform_1(%arg0: i32) -> (i32, i32, i32) {
    %c0_i32 = arith.constant 0 : i32
    %c0_i32_0 = arith.constant 0 : i32
    %c0_i32_1 = arith.constant 0 : i32
    %c0_i32_2 = arith.constant 0 : i32
    return %c0_i32, %c0_i32_0, %c0_i32_1 : i32, i32, i32
  }
  func.func @transform_2(%arg0: i32) -> (i32, i32, i32) {
    %c0_i32 = arith.constant 0 : i32
    %c0_i32_0 = arith.constant 0 : i32
    %c0_i32_1 = arith.constant 0 : i32
    %c0_i32_2 = arith.constant 0 : i32
    return %c0_i32, %c0_i32_0, %c0_i32_1 : i32, i32, i32
  }
  func.func @transform_3(%arg0: i32) -> (i32, i32, i32) {
    %c0_i32 = arith.constant 0 : i32
    %c0_i32_0 = arith.constant 0 : i32
    %c0_i32_1 = arith.constant 0 : i32
    %c0_i32_2 = arith.constant 0 : i32
    return %c0_i32, %c0_i32_0, %c0_i32_1 : i32, i32, i32
  }
}

</mosaic_0001>

<bundles_post_ra>
// kernel: tpu_custom_call.1
= control target key start
LH: loop header
LB: loop body
LE: loop exit
PB: predicated region body
PF: predicated region fallthrough
CT: control target
= control target key end

     0   :  { %8 = vsyncpa [#allocation3], 0  ;;  %s281_s0 = inlined_call_operand.hbm [shape: f32[2,4,256], index: 0, kind: input, shape index: {}]   ;;  %s282_s1 = inlined_call_operand.vmem [shape: f32[1,4,1], index: 1, kind: input, shape index: {}]   ;;  %s283_s2 = inlined_call_operand.vmem [shape: f32[1,4,1], index: 2, kind: input, shape index: {}]   ;;  %s284_s3 = inlined_call_operand.hbm [shape: f32[2,4,256], index: 3, kind: output, shape index: {}]  }
   0x1   :  { %9 = vsyncpa [#allocation4], 0  ;;  %s191_s12 = smov [#allocation2]   ;;  %s143_s16 = scalar_lea.hbm %s281_s0, 256 }
   0x2   :  { %s15_s13 = sshll.u32 %s191_s12, 4  ;;  %p144_p0 = scmp.ne.s32.totalorder %s281_s0, %s143_s16  ;;  %s16_s13 = int_to_ptr.vmem [resolvable:$true] %s15_s13 }
   0x3   :  { %p147_p1 = scmp.lt.u32.totalorder %s143_s16, %s281_s0 }
   0x5   :  { %p149_p2 = pnand %p147_p1, %p144_p0 }
   0x7   :  { %152 = shalt.err (!%p149_p2)
}
   0x8   :  { %s153_s21 = scalar_lea.vmem %s16_s13, 256  ;;  %p158_p4 = scmp.lt.s32.totalorder %s16_s13, %s16_s13 }
   0x9   :  { %p154_p3 = scmp.ne.s32.totalorder %s16_s13, %s153_s21  ;;  %p159_p5 = scmp.lt.s32.totalorder %s153_s21, %s153_s21 }
   0xb   :  { %p160_p6 = por %p159_p5, %p158_p4 }
   0xd   :  { %p161_p7 = pnand %p160_p6, %p154_p3 }
   0xf   :  { %164 = shalt.err (!%p161_p7)
}
  0x10   :  { %s192_s22 = smov 128   ;;  %s193_s23 = smov 8  }
  0x11   :  { %21 = dma.hbm_to_vmem [thread:$0]  %s281_s0, 256, %s16_s13, [#allocation3], %s192_s22, %s192_s22, %s193_s23  }
  0x12   :  { %187 = dma.done.wait [#allocation3], 256  }
  0x13   :  { %188 = vsyncadd [#allocation3], 4294967040  ;;  %vm37_vm0 = vcmask 1043456   ;;  %v232_v0 = vld [vmem:[#allocation2] sm:$0xff]  ;;  %v234_v1 = vld [vmem:[#allocation2 + $0x8] sm:$0xff]  ;;  %v194_v20 = vmov 0   ;;  %v91_v45 = vlaneseq }
  0x14   :  { %v33_v2 = vcombine.high %v232_v0, %v232_v0  ;;  %v38_v3 = vsel %vm37_vm0, %v232_v0, 0.0  ;;  %v51_v4 = vmul.f32 %v232_v0, %v232_v0  ;;  %v34_v5 = vcombine.high %v234_v1, %v234_v1  ;;  %137 = vset.pattern.permute.xlu0 %v194_v20  ;;  %138 = vset.pattern.permute.xlu1 %v194_v20  ;;  %v77_v37 = vld [vmem:[%s282_s1] sm:$0xf]  ;;  %s196_s1 = smov [#allocation5]  }
  0x15   :  { %v43_v6 = vsel %vm37_vm0, %v234_v1, 0.0  ;;  %v52_v7 = vmul.f32 %v234_v1, %v234_v1  ;;  %v81_v40 = vld [vmem:[%s283_s2] sm:$0xf]  ;;  %v195_v43 = vmov 839922192   ;;  %v92_v47 = vshrl.u32 %v91_v45, 7 }
  0x16   :  { %v39_v8 = vsel %vm37_vm0, %v33_v2, 0.0  ;;  %v55_v9 = vcombine.high %v51_v4, %v51_v4  ;;  %v59_v10 = vsel %vm37_vm0, %v51_v4, 0.0  ;;  %v44_v11 = vsel %vm37_vm0, %v34_v5, 0.0  ;;  %s119_s29 = sshll.u32 %s196_s1, 4  ;;  %s120_s29 = int_to_ptr.vmem [resolvable:$true] %s119_s29 }
  0x17   :  { %v40_v12 = vadd.f32 %v39_v8, %v38_v3  ;;  %v56_v13 = vcombine.high %v52_v7, %v52_v7  ;;  %v64_v15 = vsel %vm37_vm0, %v52_v7, 0.0  ;;  %v45_v17 = vadd.f32 %v44_v11, %v43_v6  ;;  %s165_s2 = scalar_lea.vmem %s120_s29, 256  ;;  %p170_p9 = scmp.lt.s32.totalorder %s120_s29, %s120_s29 }
  0x18   :  { %v60_v14 = vsel %vm37_vm0, %v55_v9, 0.0  ;;  %v89_v44 = vunpack.c.l.s4 %v195_v43  ;;  %p166_p8 = scmp.ne.s32.totalorder %s120_s29, %s165_s2  ;;  %p171_p10 = scmp.lt.s32.totalorder %s165_s2, %s165_s2 }
  0x19   :  { %41 = vadd.xlane.f32.xlu0 %v40_v12  ;;  %v61_v16 = vadd.f32 %v60_v14, %v59_v10  ;;  %v65_v18 = vsel %vm37_vm0, %v56_v13, 0.0 }
  0x1a   :  { %v66_v19 = vadd.f32 %v65_v18, %v64_v15  ;;  %v90_v46 = vunpack.c.0.s8 %v89_v44  ;;  %p172_p11 = por %p171_p10, %p170_p9 }
  0x1b   :  { %62 = vadd.xlane.f32.xlu1 %v61_v16 }
  0x1c   :  { %v93_v48 = vsub.s32 %v90_v46, %v92_v47  ;;  %p173_p12 = pnand %p172_p11, %p166_p8 }
  0x1d   :  { %46 = vadd.xlane.f32.xlu0 %v45_v17 }
  0x1f   :  { %67 = vadd.xlane.f32.xlu1 %v66_v19 }
  0xa6   :  { %v42_v21 = vpop.xlane.xlu0 %41 }
  0xa7   :  { %v48_v24 = vsel %vm37_vm0, %v42_v21, 0.0 }
  0xa8   :  { %v63_v22 = vpop.xlane.xlu1 %62 }
  0xa9   :  { %v69_v28 = vsel %vm37_vm0, %v63_v22, 0.0 }
  0xaa   :  { %v47_v23 = vpop.xlane.xlu0 %46 }
  0xab   :  { %v49_v25 = vsel %vm37_vm0, %v47_v23, 0.0 }
  0xac   :  { %v50_v26 = vadd.f32 %v49_v25, %v48_v24  ;;  %v68_v27 = vpop.xlane.xlu1 %67 }
  0xad   :  { %v70_v29 = vsel %vm37_vm0, %v68_v27, 0.0 }
  0xae   :  { %v72_v30 = vmul.f32 0.001953125, %v50_v26  ;;  %v71_v31 = vadd.f32 %v70_v29, %v69_v28 }
  0xb0   :  { %v74_v32 = vmul.f32 %v72_v30, %v72_v30  ;;  %v73_v33 = vmul.f32 0.001953125, %v71_v31 }
  0xb2   :  { %v75_v34 = vsub.f32 %v73_v33, %v74_v32 }
  0xb4   :  { %v76_v35 = vmax.f32 %v75_v34, 0.0 }
  0xb6   :  { %v78_v36 = vadd.f32 1e-05, %v76_v35 }
  0xb8   :  { %141 = vrsqrt.f32 %v78_v36 }
  0xc2   :  { %v142_v38 = vpop.eup %141 }
  0xc3   :  { %v80_v39 = vmul.f32 %v142_v38, %v77_v37 }
  0xc5   :  { %86 = vperm.xlu0 %137, %v80_v39   ;;  %v82_v41 = vmul.f32 %v80_v39, %v72_v30 }
  0xc7   :  { %v83_v42 = vsub.f32 %v81_v40, %v82_v41 }
  0xc9   :  { %100 = vperm.xlu1 %138, %v83_v42  }
 0x144   :  { %v87_v49 = vpop.permute.xlu0 %86 }
 0x145   :  { %v94_v50 = vrot.slane %v87_v49, %v93_v48 }
 0x147   :  { %v96_v52 = vmul.f32 %v94_v50, %v232_v0  ;;  %v97_v53 = vmul.f32 %v94_v50, %v234_v1 }
 0x148   :  { %v101_v51 = vpop.permute.xlu1 %100 }
 0x149   :  { %v108_v54 = vrot.slane %v101_v51, %v93_v48 }
 0x14b   :  { %v110_v55 = vadd.f32 %v108_v54, %v96_v52  ;;  %v111_v56 = vadd.f32 %v108_v54, %v97_v53 }
 0x14d   :  { %112 = vst [vmem:[#allocation5] sm:$0xff] %v110_v55  ;;  %113 = vst [vmem:[#allocation5 + $0x8] sm:$0xff] %v111_v56 }
 0x14e   :  { %176 = shalt.err (!%p173_p12)
}
 0x14f   :  { %s177_s5 = scalar_lea.hbm %s284_s3, 256 }
 0x150   :  { %p178_p13 = scmp.ne.s32.totalorder %s284_s3, %s177_s5  ;;  %p181_p0 = scmp.lt.u32.totalorder %s177_s5, %s284_s3 }
 0x152   :  { %p183_p1 = pnand %p181_p0, %p178_p13 }
 0x154   :  { %186 = shalt.err (!%p183_p1)
}
 0x155   :  { %125 = dma.vmem_to_hbm [thread:$0]  %s120_s29, 256, %s284_s3, [#allocation4], %s192_s22, %s192_s22, %s193_s23  }
 0x156   :  { %189 = dma.done.wait [#allocation4], 256  }
 0x157   :  { %190 = vsyncadd [#allocation4], 4294967040 }
 0x158   :  { %129 = vsyncpa [#allocation3], 1 }
 0x159   :  { %130 = vsyncpa [#allocation4], 1 }

</bundles_post_ra>
